<compile_context>
chip_gen: v6e
topology: v6e:2x2x1
jax: 0.10.0
libtpu: 0.0.40
codegen_flags: <defaults>
</compile_context>

<pallas_src>
import functools
import math

import numpy as np
import jax
import jax.numpy as jnp
from jax import lax
from jax.experimental import pallas as pl
from jax.experimental.pallas import tpu as pltpu


# ----------------------------------------------------------------------------
# Fused kernel: one grid step == (Euler propagate to obs_time) + event update.
# Grid step n_events == prop_to_end (Euler only).
# ----------------------------------------------------------------------------
def _fused_kernel(nsteps_ref,                                   # SMEM prefetch
                  bcol_ref, brow_ref, x_ref, m_ref,             # per-event blocks
                  ow1_ref, ob1_ref, ow2_ref, ob2_ref,           # ODEFunc (w2,b2 pre-scaled by dt)
                  pw1_ref, pb1_ref, pw2_ref, pb2_ref,           # p_model
                  wx_ref, wh_ref, lb_ref,                       # fused LSTM gates
                  h_ref, c_ref, loss_ref, msum_ref):            # resident outputs
    i = pl.program_id(0)
    n_events = pl.num_programs(0) - 1
    n_samples, hidden = h_ref.shape
    max_obs = x_ref.shape[0]

    # ---- init persistent state / accumulators on the first grid step.
    @pl.when(i == 0)
    def _():
        h_ref[...] = jnp.zeros_like(h_ref)
        c_ref[...] = jnp.zeros_like(c_ref)
        loss_ref[...] = jnp.zeros_like(loss_ref)
        msum_ref[...] = jnp.zeros_like(msum_ref)

    # ---- Euler propagation: n_steps[i] updates, weights stay in vregs.
    #      h <- h + tanh(h @ W1 + b1) @ (dt*W2) + dt*b2
    w1 = ow1_ref[...]
    b1 = ob1_ref[...]
    w2 = ow2_ref[...]
    b2 = ob2_ref[...]

    def euler_body(_, h):
        z = jnp.tanh(jnp.dot(h, w1, preferred_element_type=jnp.float32) + b1)
        return h + jnp.dot(z, w2, preferred_element_type=jnp.float32) + b2

    h_ref[...] = lax.fori_loop(0, nsteps_ref[i], euler_body, h_ref[...])

    # ---- Event update (skipped on the final prop_to_end grid step).
    @pl.when(i < n_events)
    def _():
        h = h_ref[...]
        c = c_ref[...]
        x = x_ref[...]
        m = m_ref[...]

        # One-hot gather (g: [max_obs, n_samples]) / scatter (gt: transpose)
        # matrices built in-register from the event's (padded) batch indices.
        # Padded rows carry the sentinel index n_samples -> all-zero rows, so
        # they neither gather state nor scatter back nor count in the mask.
        g = (lax.broadcasted_iota(jnp.int32, (max_obs, n_samples), 1)
             == bcol_ref[...]).astype(jnp.float32)
        gt = (lax.broadcasted_iota(jnp.int32, (n_samples, max_obs), 0)
              == brow_ref[...]).astype(jnp.float32)

        h_rows = jnp.dot(g, h, preferred_element_type=jnp.float32)
        c_rows = jnp.dot(g, c, preferred_element_type=jnp.float32)

        # p_model: Linear -> ReLU -> Dropout(identity, eval mode) -> Linear
        # TODO(synk): training-mode stochastic dropout is not reproduced here.
        z = jnp.maximum(
            jnp.dot(h_rows, pw1_ref[...], preferred_element_type=jnp.float32)
            + pb1_ref[...], 0.0)
        p_rows = (jnp.dot(z, pw2_ref[...], preferred_element_type=jnp.float32)
                  + pb2_ref[...])

        # Masked MAE / mask-count accumulators (padded rows have M == 0).
        loss_ref[...] += jnp.sum(jnp.abs(x - p_rows) * m, keepdims=True)
        msum_ref[...] += jnp.sum(m, keepdims=True)

        # Fused LSTM: one lane-full [*, 4H] gate block, order [i|f|o|c~].
        gates = (jnp.dot(x, wx_ref[...], preferred_element_type=jnp.float32)
                 + jnp.dot(h_rows, wh_ref[...], preferred_element_type=jnp.float32)
                 + lb_ref[...])
        i_g = jax.nn.sigmoid(gates[:, 0 * hidden:1 * hidden])
        f_g = jax.nn.sigmoid(gates[:, 1 * hidden:2 * hidden])
        o_g = jax.nn.sigmoid(gates[:, 2 * hidden:3 * hidden])
        c_t = jnp.tanh(gates[:, 3 * hidden:4 * hidden])
        c_new = f_g * c_rows + i_g * c_t
        h_new = o_g * jnp.tanh(c_new)

        # Scatter rows back: mask[s] == 1 for updated rows (i_obs assumed
        # unique within an event, matching .at[i_obs].set() semantics).
        mask = jnp.sum(gt, axis=1, keepdims=True)                # [n_samples, 1]
        h_ref[...] = h * (1.0 - mask) + jnp.dot(
            gt, h_new, preferred_element_type=jnp.float32)
        c_ref[...] = c * (1.0 - mask) + jnp.dot(
            gt, c_new, preferred_element_type=jnp.float32)


# ----------------------------------------------------------------------------
# One compile per (sequence-structure, model-size) configuration.
# ----------------------------------------------------------------------------
@functools.lru_cache(maxsize=None)
def _build_fused_call(n_events, max_obs, n_samples, input_size, hidden, cell):
    ev3 = lambda i, ns: (i, 0, 0)        # per-event block
    cst = lambda i, ns: (0, 0)           # resident (weights / outputs)

    in_specs = [
        pl.BlockSpec((None, max_obs, 1), ev3),             # batch idx (column form)
        pl.BlockSpec((None, 1, max_obs), ev3),             # batch idx (row form)
        pl.BlockSpec((None, max_obs, input_size), ev3),    # X (padded)
        pl.BlockSpec((None, max_obs, input_size), ev3),    # M (padded)
        pl.BlockSpec((hidden, hidden), cst),               # ode_w1_t
        pl.BlockSpec((1, hidden), cst),                    # ode_b1
        pl.BlockSpec((hidden, hidden), cst),               # ode_w2_t * dt
        pl.BlockSpec((1, hidden), cst),                    # ode_b2 * dt
        pl.BlockSpec((hidden, hidden), cst),               # p_w1_t
        pl.BlockSpec((1, hidden), cst),                    # p_b1
        pl.BlockSpec((hidden, input_size), cst),           # p_w2_t
        pl.BlockSpec((1, input_size), cst),                # p_b2
        pl.BlockSpec((input_size, 4 * hidden), cst),       # lstm_wx_t
        pl.BlockSpec((hidden, 4 * hidden), cst),           # lstm_wh_t
        pl.BlockSpec((1, 4 * hidden), cst),                # lstm_b
    ]
    out_specs = (
        pl.BlockSpec((n_samples, hidden), cst),            # h   (resident)
        pl.BlockSpec((n_samples, cell), cst),              # c   (resident)
        pl.BlockSpec((1, 1), cst),                         # loss accumulator
        pl.BlockSpec((1, 1), cst),                         # mask-count accumulator
    )
    out_shape = (
        jax.ShapeDtypeStruct((n_samples, hidden), jnp.float32),
        jax.ShapeDtypeStruct((n_samples, cell), jnp.float32),
        jax.ShapeDtypeStruct((1, 1), jnp.float32),
        jax.ShapeDtypeStruct((1, 1), jnp.float32),
    )
    call = pl.pallas_call(
        _fused_kernel,
        out_shape=out_shape,
        grid_spec=pltpu.PrefetchScalarGridSpec(
            num_scalar_prefetch=1,
            grid=(n_events + 1,),
            in_specs=in_specs,
            out_specs=out_specs,
        ),
        compiler_params=pltpu.CompilerParams(
            dimension_semantics=("arbitrary",)),   # sequential recurrence
    )
    return jax.jit(call)


# ----------------------------------------------------------------------------
# ODELSTM forward: host pre-pass (step counts + event padding), one kernel.
# ----------------------------------------------------------------------------
def odelstm_forward(kp, obs_times, event_pt, X, M, batch_idx, n_samples, T,
                    dt=0.05):
    assert abs(kp["dt"] - dt) < 1e-12, "params were prepared for a different dt"
    hidden = kp["hidden_size"]
    cell = kp["cell_size"]
    input_size = kp["input_size"]
    n_events = len(obs_times)

    # Euler step counts per segment; same python-float accumulation PyTorch uses.
    n_steps = []
    current_time = 0.0
    for obs_time in obs_times:
        k = 0
        while current_time < obs_time:
            k += 1
            current_time = current_time + dt
        n_steps.append(k)
    k = 0
    while current_time < T - 0.0001 * dt:     # prop_to_end
        k += 1
        current_time = current_time + dt
    n_steps.append(k)
    n_steps = jnp.asarray(n_steps, jnp.int32)

    # Pad every event to a fixed max_obs (multiple of 8 sublanes); padded rows
    # get M = 0 and the batch-index sentinel n_samples (all-zero one-hot rows).
    sizes = [int(event_pt[e + 1]) - int(event_pt[e]) for e in range(n_events)]
    max_obs = max(8, -(-max(sizes) // 8) * 8)

    X_np = np.zeros((n_events + 1, max_obs, input_size), np.float32)
    M_np = np.zeros((n_events + 1, max_obs, input_size), np.float32)
    B_np = np.full((n_events + 1, max_obs), n_samples, np.int32)
    Xh, Mh, bh = np.asarray(X), np.asarray(M), np.asarray(batch_idx)
    for e in range(n_events):
        s, t = int(event_pt[e]), int(event_pt[e + 1])
        X_np[e, :t - s] = Xh[s:t]
        M_np[e, :t - s] = Mh[s:t]
        B_np[e, :t - s] = bh[s:t]
    b_col = jnp.asarray(B_np)[:, :, None]     # (n_events+1, max_obs, 1)
    b_row = jnp.asarray(B_np)[:, None, :]     # (n_events+1, 1, max_obs)
    X_pad = jnp.asarray(X_np)
    M_pad = jnp.asarray(M_np)

    call = _build_fused_call(n_events, max_obs, n_samples, input_size, hidden,
                             cell)
    h, c, loss, msum = call(
        n_steps, b_col, b_row, X_pad, M_pad,
        kp["ode_w1_t"], kp["ode_b1"], kp["ode_w2_t_dt"], kp["ode_b2_dt"],
        kp["p_w1_t"], kp["p_b1"], kp["p_w2_t"], kp["p_b2"],
        kp["lstm_wx_t"], kp["lstm_wh_t"], kp["lstm_b"])

    total_loss = loss[0, 0]
    return total_loss, total_loss / msum[0, 0]


# ----------------------------------------------------------------------------
# Pure-JAX reference (for correctness check of the kernel).
# ----------------------------------------------------------------------------
def _ref_forward(params, obs_times, event_pt, X, M, batch_idx, n_samples, T,
                 dt=0.05):
    hidden = params["hidden_size"]
    h = jnp.zeros((n_samples, hidden), jnp.float32)
    c = jnp.zeros((n_samples, params["cell_size"]), jnp.float32)

    def p_model_ref(h):
        z = jnp.maximum(h @ params["p_w1"].T + params["p_b1"], 0.0)
        return z @ params["p_w2"].T + params["p_b2"]

    def euler_ref(h):
        z = jnp.tanh(h @ params["ode_w1"].T + params["ode_b1"])
        dh = z @ params["ode_w2"].T + params["ode_b2"]
        return h + dt * dh

    def lstm_ref(x, h, c):
        def lin(wx, wh, b):
            return x @ wx.T + h @ wh.T + b
        i = jax.nn.sigmoid(lin(params["lstm_wix"], params["lstm_wih"], params["lstm_bi"]))
        f = jax.nn.sigmoid(lin(params["lstm_wfx"], params["lstm_wfh"], params["lstm_bf"]))
        o = jax.nn.sigmoid(lin(params["lstm_wox"], params["lstm_woh"], params["lstm_bo"]))
        ct = jnp.tanh(lin(params["lstm_wcx"], params["lstm_wch"], params["lstm_bc"]))
        c_new = f * c + i * ct
        return o * jnp.tanh(c_new), c_new

    current_time = 0.0
    loss = jnp.float32(0.0)
    total_M_obs = jnp.float32(0.0)
    for i, obs_time in enumerate(obs_times):
        while current_time < obs_time:
            h = euler_ref(h)
            current_time += dt
        start, end = int(event_pt[i]), int(event_pt[i + 1])
        X_obs, M_obs, i_obs = X[start:end], M[start:end], batch_idx[start:end]
        p = p_model_ref(h)
        loss = loss + jnp.sum(jnp.abs(X_obs - p[i_obs]) * M_obs)
        total_M_obs = total_M_obs + jnp.sum(M_obs)
        h_new, c_new = lstm_ref(X_obs, h[i_obs], c[i_obs])
        h = h.at[i_obs].set(h_new)
        c = c.at[i_obs].set(c_new)
    while current_time < T - 0.0001 * dt:
        h = euler_ref(h)
        current_time += dt
    return loss, loss / total_M_obs


# ----------------------------------------------------------------------------
# Deterministic parameter init (mirrors init_weights: xavier_uniform W, bias 0.01)
# ----------------------------------------------------------------------------
def _xavier(key, out_f, in_f):
    a = math.sqrt(6.0 / (in_f + out_f))
    return jax.random.uniform(key, (out_f, in_f), jnp.float32, -a, a)


def make_params(key, input_size, hidden_size, cell_size):
    keys = jax.random.split(key, 8)
    IH = input_size + hidden_size
    params = {"hidden_size": hidden_size, "cell_size": cell_size,
              "input_size": input_size}
    for n, k in zip("ifoc", keys[:4]):
        w = _xavier(k, hidden_size, IH)
        params[f"lstm_w{n}x"] = w[:, :input_size]
        params[f"lstm_w{n}h"] = w[:, input_size:]
        params[f"lstm_b{n}"] = jnp.full((1, hidden_size), 0.01, jnp.float32)
    params["ode_w1"] = _xavier(keys[4], hidden_size, hidden_size)
    params["ode_b1"] = jnp.full((1, hidden_size), 0.01, jnp.float32)
    params["ode_w2"] = _xavier(keys[5], hidden_size, hidden_size)
    params["ode_b2"] = jnp.full((1, hidden_size), 0.01, jnp.float32)
    params["p_w1"] = _xavier(keys[6], hidden_size, hidden_size)
    params["p_b1"] = jnp.full((1, hidden_size), 0.01, jnp.float32)
    params["p_w2"] = _xavier(keys[7], input_size, hidden_size)
    params["p_b2"] = jnp.full((1, input_size), 0.01, jnp.float32)
    return params


def prepare_kernel_params(params, dt=0.05):
    """Host-side, once: pre-transpose weights to [in, out], fuse the four LSTM
    gate weights into one lane-full [*, 4H] block (order i,f,o,c~), and
    pre-scale the ODE second layer by dt (removes the per-step dt* multiply)."""
    kp = {"hidden_size": params["hidden_size"],
          "cell_size": params["cell_size"],
          "input_size": params["input_size"],
          "dt": float(dt)}
    kp["ode_w1_t"] = params["ode_w1"].T
    kp["ode_b1"] = params["ode_b1"]
    kp["ode_w2_t_dt"] = params["ode_w2"].T * dt
    kp["ode_b2_dt"] = params["ode_b2"] * dt
    kp["p_w1_t"] = params["p_w1"].T
    kp["p_w2_t"] = params["p_w2"].T
    kp["p_b1"] = params["p_b1"]
    kp["p_b2"] = params["p_b2"]
    wx = jnp.concatenate([params[f"lstm_w{g}x"] for g in "ifoc"], axis=0)  # [4H, in]
    wh = jnp.concatenate([params[f"lstm_w{g}h"] for g in "ifoc"], axis=0)  # [4H, H]
    b = jnp.concatenate([params[f"lstm_b{g}"] for g in "ifoc"], axis=1)    # [1, 4H]
    kp["lstm_wx_t"] = wx.T
    kp["lstm_wh_t"] = wh.T
    kp["lstm_b"] = b
    return kp


# ----------------------------------------------------------------------------
if __name__ == "__main__":
    key = jax.random.PRNGKey(0)
    k_par, k_x, k_m = jax.random.split(key, 3)

    input_size = 4
    hidden_size = 32
    cell_size = 32
    n_samples = 8            # sample_idx.shape[0]
    dt = 0.05
    T = 0.45

    params = make_params(k_par, input_size, hidden_size, cell_size)
    kparams = prepare_kernel_params(params, dt=dt)

    # Event structure: 3 observation times, event_pt partitions the flat obs.
    obs_times = [0.10, 0.20, 0.35]
    event_pt = [0, 3, 6, 8]
    total_obs = event_pt[-1]
    X = jax.random.normal(k_x, (total_obs, input_size), jnp.float32)
    M = (jax.random.uniform(k_m, (total_obs, input_size)) > 0.5).astype(jnp.float32)
    batch_idx = jnp.array([0, 1, 2, 3, 4, 5, 6, 7], dtype=jnp.int32)

    loss, loss_norm = odelstm_forward(
        kparams, obs_times, event_pt, X, M, batch_idx, n_samples, T, dt=dt
    )
    loss, loss_norm = jax.block_until_ready((loss, loss_norm))

    ref_loss, ref_loss_norm = _ref_forward(
        params, obs_times, event_pt, X, M, batch_idx, n_samples, T, dt=dt
    )
    assert jnp.allclose(loss, ref_loss, rtol=1e-3, atol=1e-3), (loss, ref_loss)
    assert jnp.allclose(loss_norm, ref_loss_norm, rtol=1e-3, atol=1e-3), (
        loss_norm, ref_loss_norm)

    print("KERNEL_OK")
</pallas_src>

<mosaic_0001>
module attributes {stable_mosaic.version = 11 : i64} {
  func.func @_fused_kernel(%arg0: i32, %arg1: memref<4xi32, #tpu.memory_space<smem>>, %arg2: memref<1x8x1xi32, #tpu.memory_space<vmem>>, %arg3: memref<1x1x8xi32, #tpu.memory_space<vmem>>, %arg4: memref<1x8x4xf32, #tpu.memory_space<vmem>>, %arg5: memref<1x8x4xf32, #tpu.memory_space<vmem>>, %arg6: memref<32x32xf32, #tpu.memory_space<vmem>>, %arg7: memref<1x32xf32, #tpu.memory_space<vmem>>, %arg8: memref<32x32xf32, #tpu.memory_space<vmem>>, %arg9: memref<1x32xf32, #tpu.memory_space<vmem>>, %arg10: memref<32x32xf32, #tpu.memory_space<vmem>>, %arg11: memref<1x32xf32, #tpu.memory_space<vmem>>, %arg12: memref<32x4xf32, #tpu.memory_space<vmem>>, %arg13: memref<1x4xf32, #tpu.memory_space<vmem>>, %arg14: memref<4x128xf32, #tpu.memory_space<vmem>>, %arg15: memref<32x128xf32, #tpu.memory_space<vmem>>, %arg16: memref<1x128xf32, #tpu.memory_space<vmem>>, %arg17: memref<8x32xf32, #tpu.memory_space<vmem>>, %arg18: memref<8x32xf32, #tpu.memory_space<vmem>>, %arg19: memref<1x1xf32, #tpu.memory_space<vmem>>, %arg20: memref<1x1xf32, #tpu.memory_space<vmem>>) attributes {dimension_semantics = [#tpu.dimension_semantics<arbitrary>], iteration_bounds = array<i64: 4>, scalar_prefetch = 1 : i64, scratch_operands = 0 : i64, tpu.core_type = #tpu.core_type<tc>, window_params = [{transform_indices = @transform_0, window_bounds = array<i64: 1, 8, 1>}, {transform_indices = @transform_1, window_bounds = array<i64: 1, 1, 8>}, {transform_indices = @transform_2, window_bounds = array<i64: 1, 8, 4>}, {transform_indices = @transform_3, window_bounds = array<i64: 1, 8, 4>}, {pipeline_mode = #tpu.pipeline_mode<synchronous>, transform_indices = @transform_4, window_bounds = array<i64: 32, 32>}, {pipeline_mode = #tpu.pipeline_mode<synchronous>, transform_indices = @transform_5, window_bounds = array<i64: 1, 32>}, {pipeline_mode = #tpu.pipeline_mode<synchronous>, transform_indices = @transform_6, window_bounds = array<i64: 32, 32>}, {pipeline_mode = #tpu.pipeline_mode<synchronous>, transform_indices = @transform_7, window_bounds = array<i64: 1, 32>}, {pipeline_mode = #tpu.pipeline_mode<synchronous>, transform_indices = @transform_8, window_bounds = array<i64: 32, 32>}, {pipeline_mode = #tpu.pipeline_mode<synchronous>, transform_indices = @transform_9, window_bounds = array<i64: 1, 32>}, {pipeline_mode = #tpu.pipeline_mode<synchronous>, transform_indices = @transform_10, window_bounds = array<i64: 32, 4>}, {pipeline_mode = #tpu.pipeline_mode<synchronous>, transform_indices = @transform_11, window_bounds = array<i64: 1, 4>}, {pipeline_mode = #tpu.pipeline_mode<synchronous>, transform_indices = @transform_12, window_bounds = array<i64: 4, 128>}, {pipeline_mode = #tpu.pipeline_mode<synchronous>, transform_indices = @transform_13, window_bounds = array<i64: 32, 128>}, {pipeline_mode = #tpu.pipeline_mode<synchronous>, transform_indices = @transform_14, window_bounds = array<i64: 1, 128>}, {pipeline_mode = #tpu.pipeline_mode<synchronous>, transform_indices = @transform_15, window_bounds = array<i64: 8, 32>}, {pipeline_mode = #tpu.pipeline_mode<synchronous>, transform_indices = @transform_16, window_bounds = array<i64: 8, 32>}, {pipeline_mode = #tpu.pipeline_mode<synchronous>, transform_indices = @transform_17, window_bounds = array<i64: 1, 1>}, {pipeline_mode = #tpu.pipeline_mode<synchronous>, transform_indices = @transform_18, window_bounds = array<i64: 1, 1>}]} {
    %c0_i32 = arith.constant 0 : i32
    %0 = arith.cmpi eq, %arg0, %c0_i32 : i32
    %1 = arith.extui %0 : i1 to i32
    %c0_i32_0 = arith.constant 0 : i32
    %2 = arith.cmpi ne, %1, %c0_i32_0 : i32
    scf.if %2 {
      %cst = arith.constant 0.000000e+00 : f32
      %17 = vector.broadcast %cst : f32 to vector<8x32xf32>
      %c0_14 = arith.constant 0 : index
      %c0_15 = arith.constant 0 : index
      %18 = vector.load %arg17[%c0_14, %c0_15] : memref<8x32xf32, #tpu.memory_space<vmem>>, vector<8x32xf32>
      tpu.vector_store %arg17[%c0_14, %c0_15], %17 {strides = array<i32>} : memref<8x32xf32, #tpu.memory_space<vmem>>, vector<8x32xf32>,
      %cst_16 = arith.constant 0.000000e+00 : f32
      %19 = vector.broadcast %cst_16 : f32 to vector<8x32xf32>
      %c0_17 = arith.constant 0 : index
      %c0_18 = arith.constant 0 : index
      %20 = vector.load %arg18[%c0_17, %c0_18] : memref<8x32xf32, #tpu.memory_space<vmem>>, vector<8x32xf32>
      tpu.vector_store %arg18[%c0_17, %c0_18], %19 {strides = array<i32>} : memref<8x32xf32, #tpu.memory_space<vmem>>, vector<8x32xf32>,
      %cst_19 = arith.constant 0.000000e+00 : f32
      %21 = vector.broadcast %cst_19 : f32 to vector<1x1xf32>
      %c0_20 = arith.constant 0 : index
      %c0_21 = arith.constant 0 : index
      %22 = vector.load %arg19[%c0_20, %c0_21] : memref<1x1xf32, #tpu.memory_space<vmem>>, vector<1x1xf32>
      tpu.vector_store %arg19[%c0_20, %c0_21], %21 {strides = array<i32>} : memref<1x1xf32, #tpu.memory_space<vmem>>, vector<1x1xf32>,
      %cst_22 = arith.constant 0.000000e+00 : f32
      %23 = vector.broadcast %cst_22 : f32 to vector<1x1xf32>
      %c0_23 = arith.constant 0 : index
      %c0_24 = arith.constant 0 : index
      %24 = vector.load %arg20[%c0_23, %c0_24] : memref<1x1xf32, #tpu.memory_space<vmem>>, vector<1x1xf32>
      tpu.vector_store %arg20[%c0_23, %c0_24], %23 {strides = array<i32>} : memref<1x1xf32, #tpu.memory_space<vmem>>, vector<1x1xf32>,
    } else {
    }
    %c0 = arith.constant 0 : index
    %c0_1 = arith.constant 0 : index
    %3 = vector.load %arg6[%c0, %c0_1] : memref<32x32xf32, #tpu.memory_space<vmem>>, vector<32x32xf32>
    %c0_2 = arith.constant 0 : index
    %c0_3 = arith.constant 0 : index
    %4 = vector.load %arg7[%c0_2, %c0_3] : memref<1x32xf32, #tpu.memory_space<vmem>>, vector<1x32xf32>
    %c0_4 = arith.constant 0 : index
    %c0_5 = arith.constant 0 : index
    %5 = vector.load %arg8[%c0_4, %c0_5] : memref<32x32xf32, #tpu.memory_space<vmem>>, vector<32x32xf32>
    %c0_6 = arith.constant 0 : index
    %c0_7 = arith.constant 0 : index
    %6 = vector.load %arg9[%c0_6, %c0_7] : memref<1x32xf32, #tpu.memory_space<vmem>>, vector<1x32xf32>
    %7 = arith.index_cast %arg0 : i32 to index
    %8 = memref.load %arg1[%7] : memref<4xi32, #tpu.memory_space<smem>>
    %c0_8 = arith.constant 0 : index
    %c0_9 = arith.constant 0 : index
    %9 = vector.load %arg17[%c0_8, %c0_9] : memref<8x32xf32, #tpu.memory_space<vmem>>, vector<8x32xf32>
    %c0_i32_10 = arith.constant 0 : i32
    %10 = arith.subi %8, %c0_i32_10 : i32
    %11 = arith.addi %c0_i32_10, %10 : i32
    %c1_i32 = arith.constant 1 : i32
    %12 = scf.for %arg21 = %c0_i32_10 to %11 step %c1_i32 iter_args(%arg22 = %9) -> (vector<8x32xf32>)  : i32 {
      %cst = arith.constant dense<0.000000e+00> : vector<8x32xf32>
      %17 = tpu.matmul %arg22, %3, %cst {dimension_numbers = #tpu.dot_dimension_numbers<[1], [0], [0], [1], [0, 0, 1, 1], [], []>} : vector<8x32xf32>, vector<32x32xf32>, vector<8x32xf32> -> vector<8x32xf32>
      %18 = vector.broadcast %4 : vector<1x32xf32> to vector<8x32xf32>
      %19 = arith.addf %17, %18 : vector<8x32xf32>
      %20 = math.tanh %19 : vector<8x32xf32>
      %cst_14 = arith.constant dense<0.000000e+00> : vector<8x32xf32>
      %21 = tpu.matmul %20, %5, %cst_14 {dimension_numbers = #tpu.dot_dimension_numbers<[1], [0], [0], [1], [0, 0, 1, 1], [], []>} : vector<8x32xf32>, vector<32x32xf32>, vector<8x32xf32> -> vector<8x32xf32>
      %22 = arith.addf %arg22, %21 : vector<8x32xf32>
      %23 = vector.broadcast %6 : vector<1x32xf32> to vector<8x32xf32>
      %24 = arith.addf %22, %23 : vector<8x32xf32>
      scf.yield %24 : vector<8x32xf32>
    }
    %c0_11 = arith.constant 0 : index
    %c0_12 = arith.constant 0 : index
    %13 = vector.load %arg17[%c0_11, %c0_12] : memref<8x32xf32, #tpu.memory_space<vmem>>, vector<8x32xf32>
    tpu.vector_store %arg17[%c0_11, %c0_12], %12 {strides = array<i32>} : memref<8x32xf32, #tpu.memory_space<vmem>>, vector<8x32xf32>,
    %c3_i32 = arith.constant 3 : i32
    %14 = arith.cmpi slt, %arg0, %c3_i32 : i32
    %15 = arith.extui %14 : i1 to i32
    %c0_i32_13 = arith.constant 0 : i32
    %16 = arith.cmpi ne, %15, %c0_i32_13 : i32
    scf.if %16 {
      %c0_14 = arith.constant 0 : index
      %c0_15 = arith.constant 0 : index
      %17 = vector.load %arg17[%c0_14, %c0_15] : memref<8x32xf32, #tpu.memory_space<vmem>>, vector<8x32xf32>
      %c0_16 = arith.constant 0 : index
      %c0_17 = arith.constant 0 : index
      %18 = vector.load %arg18[%c0_16, %c0_17] : memref<8x32xf32, #tpu.memory_space<vmem>>, vector<8x32xf32>
      %c0_18 = arith.constant 0 : index
      %c0_19 = arith.constant 0 : index
      %c0_20 = arith.constant 0 : index
      %19 = vector.load %arg4[%c0_18, %c0_19, %c0_20] : memref<1x8x4xf32, #tpu.memory_space<vmem>>, vector<1x8x4xf32>
      %20 = vector.shape_cast %19 : vector<1x8x4xf32> to vector<8x4xf32>
      %c0_21 = arith.constant 0 : index
      %c0_22 = arith.constant 0 : index
      %c0_23 = arith.constant 0 : index
      %21 = vector.load %arg5[%c0_21, %c0_22, %c0_23] : memref<1x8x4xf32, #tpu.memory_space<vmem>>, vector<1x8x4xf32>
      %22 = vector.shape_cast %21 : vector<1x8x4xf32> to vector<8x4xf32>
      %23 = tpu.iota {dimensions = array<i32: 1>} : vector<8x8xi32>
      %c0_24 = arith.constant 0 : index
      %c0_25 = arith.constant 0 : index
      %c0_26 = arith.constant 0 : index
      %24 = vector.load %arg2[%c0_24, %c0_25, %c0_26] : memref<1x8x1xi32, #tpu.memory_space<vmem>>, vector<1x8x1xi32>
      %25 = vector.shape_cast %24 : vector<1x8x1xi32> to vector<8x1xi32>
      %26 = vector.broadcast %25 : vector<8x1xi32> to vector<8x8xi32>
      %27 = arith.cmpi eq, %23, %26 : vector<8x8xi32>
      %28 = arith.extui %27 : vector<8x8xi1> to vector<8x8xi32>
      %29 = arith.sitofp %28 : vector<8x8xi32> to vector<8x8xf32>
      %30 = tpu.iota {dimensions = array<i32: 0>} : vector<8x8xi32>
      %c0_27 = arith.constant 0 : index
      %c0_28 = arith.constant 0 : index
      %c0_29 = arith.constant 0 : index
      %31 = vector.load %arg3[%c0_27, %c0_28, %c0_29] : memref<1x1x8xi32, #tpu.memory_space<vmem>>, vector<1x1x8xi32>
      %32 = vector.shape_cast %31 : vector<1x1x8xi32> to vector<1x8xi32>
      %33 = vector.broadcast %32 : vector<1x8xi32> to vector<8x8xi32>
      %34 = arith.cmpi eq, %30, %33 : vector<8x8xi32>
      %35 = arith.extui %34 : vector<8x8xi1> to vector<8x8xi32>
      %36 = arith.sitofp %35 : vector<8x8xi32> to vector<8x8xf32>
      %cst = arith.constant dense<0.000000e+00> : vector<8x32xf32>
      %37 = tpu.matmul %29, %17, %cst {dimension_numbers = #tpu.dot_dimension_numbers<[1], [0], [0], [1], [0, 0, 1, 1], [], []>} : vector<8x8xf32>, vector<8x32xf32>, vector<8x32xf32> -> vector<8x32xf32>
      %cst_30 = arith.constant dense<0.000000e+00> : vector<8x32xf32>
      %38 = tpu.matmul %29, %18, %cst_30 {dimension_numbers = #tpu.dot_dimension_numbers<[1], [0], [0], [1], [0, 0, 1, 1], [], []>} : vector<8x8xf32>, vector<8x32xf32>, vector<8x32xf32> -> vector<8x32xf32>
      %c0_31 = arith.constant 0 : index
      %c0_32 = arith.constant 0 : index
      %39 = vector.load %arg10[%c0_31, %c0_32] : memref<32x32xf32, #tpu.memory_space<vmem>>, vector<32x32xf32>
      %cst_33 = arith.constant dense<0.000000e+00> : vector<8x32xf32>
      %40 = tpu.matmul %37, %39, %cst_33 {dimension_numbers = #tpu.dot_dimension_numbers<[1], [0], [0], [1], [0, 0, 1, 1], [], []>} : vector<8x32xf32>, vector<32x32xf32>, vector<8x32xf32> -> vector<8x32xf32>
      %c0_34 = arith.constant 0 : index
      %c0_35 = arith.constant 0 : index
      %41 = vector.load %arg11[%c0_34, %c0_35] : memref<1x32xf32, #tpu.memory_space<vmem>>, vector<1x32xf32>
      %42 = vector.broadcast %41 : vector<1x32xf32> to vector<8x32xf32>
      %43 = arith.addf %40, %42 : vector<8x32xf32>
      %cst_36 = arith.constant 0.000000e+00 : f32
      %44 = vector.broadcast %cst_36 : f32 to vector<8x32xf32>
      %45 = arith.maximumf %43, %44 : vector<8x32xf32>
      %c0_37 = arith.constant 0 : index
      %c0_38 = arith.constant 0 : index
      %46 = vector.load %arg12[%c0_37, %c0_38] : memref<32x4xf32, #tpu.memory_space<vmem>>, vector<32x4xf32>
      %cst_39 = arith.constant dense<0.000000e+00> : vector<8x4xf32>
      %47 = tpu.matmul %45, %46, %cst_39 {dimension_numbers = #tpu.dot_dimension_numbers<[1], [0], [0], [1], [0, 0, 1, 1], [], []>} : vector<8x32xf32>, vector<32x4xf32>, vector<8x4xf32> -> vector<8x4xf32>
      %c0_40 = arith.constant 0 : index
      %c0_41 = arith.constant 0 : index
      %48 = vector.load %arg13[%c0_40, %c0_41] : memref<1x4xf32, #tpu.memory_space<vmem>>, vector<1x4xf32>
      %49 = vector.broadcast %48 : vector<1x4xf32> to vector<8x4xf32>
      %50 = arith.addf %47, %49 : vector<8x4xf32>
      %c0_42 = arith.constant 0 : index
      %c0_43 = arith.constant 0 : index
      %51 = vector.load %arg19[%c0_42, %c0_43] : memref<1x1xf32, #tpu.memory_space<vmem>>, vector<1x1xf32>
      %52 = arith.subf %20, %50 : vector<8x4xf32>
      %53 = math.absf %52 : vector<8x4xf32>
      %54 = arith.mulf %53, %22 : vector<8x4xf32>
      %55 = vector.shape_cast %54 : vector<8x4xf32> to vector<1x8x4xf32>
      %cst_44 = arith.constant dense<0.000000e+00> : vector<1xf32>
      %56 = vector.multi_reduction <add>, %55, %cst_44 [1, 2] : vector<1x8x4xf32> to vector<1xf32>
      %57 = vector.shape_cast %56 : vector<1xf32> to vector<1x1x1xf32>
      %58 = vector.extract %57[0, 0, 0] : f32 from vector<1x1x1xf32>
      %59 = vector.broadcast %58 : f32 to vector<1x1xf32>
      %60 = arith.addf %51, %59 : vector<1x1xf32>
      %c0_45 = arith.constant 0 : index
      %c0_46 = arith.constant 0 : index
      %61 = vector.load %arg19[%c0_45, %c0_46] : memref<1x1xf32, #tpu.memory_space<vmem>>, vector<1x1xf32>
      tpu.vector_store %arg19[%c0_45, %c0_46], %60 {strides = array<i32>} : memref<1x1xf32, #tpu.memory_space<vmem>>, vector<1x1xf32>,
      %c0_47 = arith.constant 0 : index
      %c0_48 = arith.constant 0 : index
      %62 = vector.load %arg20[%c0_47, %c0_48] : memref<1x1xf32, #tpu.memory_space<vmem>>, vector<1x1xf32>
      %63 = vector.shape_cast %22 : vector<8x4xf32> to vector<1x8x4xf32>
      %cst_49 = arith.constant dense<0.000000e+00> : vector<1xf32>
      %64 = vector.multi_reduction <add>, %63, %cst_49 [1, 2] : vector<1x8x4xf32> to vector<1xf32>
      %65 = vector.shape_cast %64 : vector<1xf32> to vector<1x1x1xf32>
      %66 = vector.extract %65[0, 0, 0] : f32 from vector<1x1x1xf32>
      %67 = vector.broadcast %66 : f32 to vector<1x1xf32>
      %68 = arith.addf %62, %67 : vector<1x1xf32>
      %c0_50 = arith.constant 0 : index
      %c0_51 = arith.constant 0 : index
      %69 = vector.load %arg20[%c0_50, %c0_51] : memref<1x1xf32, #tpu.memory_space<vmem>>, vector<1x1xf32>
      tpu.vector_store %arg20[%c0_50, %c0_51], %68 {strides = array<i32>} : memref<1x1xf32, #tpu.memory_space<vmem>>, vector<1x1xf32>,
      %c0_52 = arith.constant 0 : index
      %c0_53 = arith.constant 0 : index
      %70 = vector.load %arg14[%c0_52, %c0_53] : memref<4x128xf32, #tpu.memory_space<vmem>>, vector<4x128xf32>
      %cst_54 = arith.constant dense<0.000000e+00> : vector<8x128xf32>
      %71 = tpu.matmul %20, %70, %cst_54 {dimension_numbers = #tpu.dot_dimension_numbers<[1], [0], [0], [1], [0, 0, 1, 1], [], []>} : vector<8x4xf32>, vector<4x128xf32>, vector<8x128xf32> -> vector<8x128xf32>
      %c0_55 = arith.constant 0 : index
      %c0_56 = arith.constant 0 : index
      %72 = vector.load %arg15[%c0_55, %c0_56] : memref<32x128xf32, #tpu.memory_space<vmem>>, vector<32x128xf32>
      %cst_57 = arith.constant dense<0.000000e+00> : vector<8x128xf32>
      %73 = tpu.matmul %37, %72, %cst_57 {dimension_numbers = #tpu.dot_dimension_numbers<[1], [0], [0], [1], [0, 0, 1, 1], [], []>} : vector<8x32xf32>, vector<32x128xf32>, vector<8x128xf32> -> vector<8x128xf32>
      %74 = arith.addf %71, %73 : vector<8x128xf32>
      %c0_58 = arith.constant 0 : index
      %c0_59 = arith.constant 0 : index
      %75 = vector.load %arg16[%c0_58, %c0_59] : memref<1x128xf32, #tpu.memory_space<vmem>>, vector<1x128xf32>
      %76 = vector.broadcast %75 : vector<1x128xf32> to vector<8x128xf32>
      %77 = arith.addf %74, %76 : vector<8x128xf32>
      %78 = vector.extract_strided_slice %77 {offsets = [0, 0], sizes = [8, 32], strides = [1, 1]} : vector<8x128xf32> to vector<8x32xf32>
      %79 = arith.negf %78 : vector<8x32xf32>
      %80 = math.exp %79 : vector<8x32xf32>
      %cst_60 = arith.constant 1.000000e+00 : f32
      %81 = vector.broadcast %cst_60 : f32 to vector<8x32xf32>
      %82 = arith.addf %81, %80 : vector<8x32xf32>
      %83 = arith.divf %81, %82 : vector<8x32xf32>
      %84 = vector.extract_strided_slice %77 {offsets = [0, 32], sizes = [8, 32], strides = [1, 1]} : vector<8x128xf32> to vector<8x32xf32>
      %85 = arith.negf %84 : vector<8x32xf32>
      %86 = math.exp %85 : vector<8x32xf32>
      %cst_61 = arith.constant 1.000000e+00 : f32
      %87 = vector.broadcast %cst_61 : f32 to vector<8x32xf32>
      %88 = arith.addf %87, %86 : vector<8x32xf32>
      %89 = arith.divf %87, %88 : vector<8x32xf32>
      %90 = vector.extract_strided_slice %77 {offsets = [0, 64], sizes = [8, 32], strides = [1, 1]} : vector<8x128xf32> to vector<8x32xf32>
      %91 = arith.negf %90 : vector<8x32xf32>
      %92 = math.exp %91 : vector<8x32xf32>
      %cst_62 = arith.constant 1.000000e+00 : f32
      %93 = vector.broadcast %cst_62 : f32 to vector<8x32xf32>
      %94 = arith.addf %93, %92 : vector<8x32xf32>
      %95 = arith.divf %93, %94 : vector<8x32xf32>
      %96 = vector.extract_strided_slice %77 {offsets = [0, 96], sizes = [8, 32], strides = [1, 1]} : vector<8x128xf32> to vector<8x32xf32>
      %97 = math.tanh %96 : vector<8x32xf32>
      %98 = arith.mulf %89, %38 : vector<8x32xf32>
      %99 = arith.mulf %83, %97 : vector<8x32xf32>
      %100 = arith.addf %98, %99 : vector<8x32xf32>
      %101 = math.tanh %100 : vector<8x32xf32>
      %102 = arith.mulf %95, %101 : vector<8x32xf32>
      %cst_63 = arith.constant dense<0.000000e+00> : vector<8xf32>
      %103 = vector.multi_reduction <add>, %36, %cst_63 [1] : vector<8x8xf32> to vector<8xf32>
      %104 = vector.shape_cast %103 : vector<8xf32> to vector<8x1xf32>
      %cst_64 = arith.constant 1.000000e+00 : f32
      %105 = vector.broadcast %cst_64 : f32 to vector<8x1xf32>
      %106 = arith.subf %105, %104 : vector<8x1xf32>
      %107 = vector.broadcast %106 : vector<8x1xf32> to vector<8x32xf32>
      %108 = arith.mulf %17, %107 : vector<8x32xf32>
      %cst_65 = arith.constant dense<0.000000e+00> : vector<8x32xf32>
      %109 = tpu.matmul %36, %102, %cst_65 {dimension_numbers = #tpu.dot_dimension_numbers<[1], [0], [0], [1], [0, 0, 1, 1], [], []>} : vector<8x8xf32>, vector<8x32xf32>, vector<8x32xf32> -> vector<8x32xf32>
      %110 = arith.addf %108, %109 : vector<8x32xf32>
      %c0_66 = arith.constant 0 : index
      %c0_67 = arith.constant 0 : index
      %111 = vector.load %arg17[%c0_66, %c0_67] : memref<8x32xf32, #tpu.memory_space<vmem>>, vector<8x32xf32>
      tpu.vector_store %arg17[%c0_66, %c0_67], %110 {strides = array<i32>} : memref<8x32xf32, #tpu.memory_space<vmem>>, vector<8x32xf32>,
      %cst_68 = arith.constant 1.000000e+00 : f32
      %112 = vector.broadcast %cst_68 : f32 to vector<8x1xf32>
      %113 = arith.subf %112, %104 : vector<8x1xf32>
      %114 = vector.broadcast %113 : vector<8x1xf32> to vector<8x32xf32>
      %115 = arith.mulf %18, %114 : vector<8x32xf32>
      %cst_69 = arith.constant dense<0.000000e+00> : vector<8x32xf32>
      %116 = tpu.matmul %36, %100, %cst_69 {dimension_numbers = #tpu.dot_dimension_numbers<[1], [0], [0], [1], [0, 0, 1, 1], [], []>} : vector<8x8xf32>, vector<8x32xf32>, vector<8x32xf32> -> vector<8x32xf32>
      %117 = arith.addf %115, %116 : vector<8x32xf32>
      %c0_70 = arith.constant 0 : index
      %c0_71 = arith.constant 0 : index
      %118 = vector.load %arg18[%c0_70, %c0_71] : memref<8x32xf32, #tpu.memory_space<vmem>>, vector<8x32xf32>
      tpu.vector_store %arg18[%c0_70, %c0_71], %117 {strides = array<i32>} : memref<8x32xf32, #tpu.memory_space<vmem>>, vector<8x32xf32>,
    } else {
    }
    return
  }
  func.func @transform_0(%arg0: i32, %arg1: memref<4xi32, #tpu.memory_space<smem>>) -> (i32, i32, i32) {
    %c0_i32 = arith.constant 0 : i32
    %c0_i32_0 = arith.constant 0 : i32
    %c0_i32_1 = arith.constant 0 : i32
    return %arg0, %c0_i32, %c0_i32_0 : i32, i32, i32
  }
  func.func @transform_1(%arg0: i32, %arg1: memref<4xi32, #tpu.memory_space<smem>>) -> (i32, i32, i32) {
    %c0_i32 = arith.constant 0 : i32
    %c0_i32_0 = arith.constant 0 : i32
    %c0_i32_1 = arith.constant 0 : i32
    return %arg0, %c0_i32, %c0_i32_0 : i32, i32, i32
  }
  func.func @transform_2(%arg0: i32, %arg1: memref<4xi32, #tpu.memory_space<smem>>) -> (i32, i32, i32) {
    %c0_i32 = arith.constant 0 : i32
    %c0_i32_0 = arith.constant 0 : i32
    %c0_i32_1 = arith.constant 0 : i32
    return %arg0, %c0_i32, %c0_i32_0 : i32, i32, i32
  }
  func.func @transform_3(%arg0: i32, %arg1: memref<4xi32, #tpu.memory_space<smem>>) -> (i32, i32, i32) {
    %c0_i32 = arith.constant 0 : i32
    %c0_i32_0 = arith.constant 0 : i32
    %c0_i32_1 = arith.constant 0 : i32
    return %arg0, %c0_i32, %c0_i32_0 : i32, i32, i32
  }
  func.func @transform_4(%arg0: i32, %arg1: memref<4xi32, #tpu.memory_space<smem>>) -> (i32, i32) {
    %c0_i32 = arith.constant 0 : i32
    %c0_i32_0 = arith.constant 0 : i32
    %c0_i32_1 = arith.constant 0 : i32
    return %c0_i32, %c0_i32_0 : i32, i32
  }
  func.func @transform_5(%arg0: i32, %arg1: memref<4xi32, #tpu.memory_space<smem>>) -> (i32, i32) {
    %c0_i32 = arith.constant 0 : i32
    %c0_i32_0 = arith.constant 0 : i32
    %c0_i32_1 = arith.constant 0 : i32
    return %c0_i32, %c0_i32_0 : i32, i32
  }
  func.func @transform_6(%arg0: i32, %arg1: memref<4xi32, #tpu.memory_space<smem>>) -> (i32, i32) {
    %c0_i32 = arith.constant 0 : i32
    %c0_i32_0 = arith.constant 0 : i32
    %c0_i32_1 = arith.constant 0 : i32
    return %c0_i32, %c0_i32_0 : i32, i32
  }
  func.func @transform_7(%arg0: i32, %arg1: memref<4xi32, #tpu.memory_space<smem>>) -> (i32, i32) {
    %c0_i32 = arith.constant 0 : i32
    %c0_i32_0 = arith.constant 0 : i32
    %c0_i32_1 = arith.constant 0 : i32
    return %c0_i32, %c0_i32_0 : i32, i32
  }
  func.func @transform_8(%arg0: i32, %arg1: memref<4xi32, #tpu.memory_space<smem>>) -> (i32, i32) {
    %c0_i32 = arith.constant 0 : i32
    %c0_i32_0 = arith.constant 0 : i32
    %c0_i32_1 = arith.constant 0 : i32
    return %c0_i32, %c0_i32_0 : i32, i32
  }
  func.func @transform_9(%arg0: i32, %arg1: memref<4xi32, #tpu.memory_space<smem>>) -> (i32, i32) {
    %c0_i32 = arith.constant 0 : i32
    %c0_i32_0 = arith.constant 0 : i32
    %c0_i32_1 = arith.constant 0 : i32
    return %c0_i32, %c0_i32_0 : i32, i32
  }
  func.func @transform_10(%arg0: i32, %arg1: memref<4xi32, #tpu.memory_space<smem>>) -> (i32, i32) {
    %c0_i32 = arith.constant 0 : i32
    %c0_i32_0 = arith.constant 0 : i32
    %c0_i32_1 = arith.constant 0 : i32
    return %c0_i32, %c0_i32_0 : i32, i32
  }
  func.func @transform_11(%arg0: i32, %arg1: memref<4xi32, #tpu.memory_space<smem>>) -> (i32, i32) {
    %c0_i32 = arith.constant 0 : i32
    %c0_i32_0 = arith.constant 0 : i32
    %c0_i32_1 = arith.constant 0 : i32
    return %c0_i32, %c0_i32_0 : i32, i32
  }
  func.func @transform_12(%arg0: i32, %arg1: memref<4xi32, #tpu.memory_space<smem>>) -> (i32, i32) {
    %c0_i32 = arith.constant 0 : i32
    %c0_i32_0 = arith.constant 0 : i32
    %c0_i32_1 = arith.constant 0 : i32
    return %c0_i32, %c0_i32_0 : i32, i32
  }
  func.func @transform_13(%arg0: i32, %arg1: memref<4xi32, #tpu.memory_space<smem>>) -> (i32, i32) {
    %c0_i32 = arith.constant 0 : i32
    %c0_i32_0 = arith.constant 0 : i32
    %c0_i32_1 = arith.constant 0 : i32
    return %c0_i32, %c0_i32_0 : i32, i32
  }
  func.func @transform_14(%arg0: i32, %arg1: memref<4xi32, #tpu.memory_space<smem>>) -> (i32, i32) {
    %c0_i32 = arith.constant 0 : i32
    %c0_i32_0 = arith.constant 0 : i32
    %c0_i32_1 = arith.constant 0 : i32
    return %c0_i32, %c0_i32_0 : i32, i32
  }
  func.func @transform_15(%arg0: i32, %arg1: memref<4xi32, #tpu.memory_space<smem>>) -> (i32, i32) {
    %c0_i32 = arith.constant 0 : i32
    %c0_i32_0 = arith.constant 0 : i32
    %c0_i32_1 = arith.constant 0 : i32
    return %c0_i32, %c0_i32_0 : i32, i32
  }
  func.func @transform_16(%arg0: i32, %arg1: memref<4xi32, #tpu.memory_space<smem>>) -> (i32, i32) {
    %c0_i32 = arith.constant 0 : i32
    %c0_i32_0 = arith.constant 0 : i32
    %c0_i32_1 = arith.constant 0 : i32
    return %c0_i32, %c0_i32_0 : i32, i32
  }
  func.func @transform_17(%arg0: i32, %arg1: memref<4xi32, #tpu.memory_space<smem>>) -> (i32, i32) {
    %c0_i32 = arith.constant 0 : i32
    %c0_i32_0 = arith.constant 0 : i32
    %c0_i32_1 = arith.constant 0 : i32
    return %c0_i32, %c0_i32_0 : i32, i32
  }
  func.func @transform_18(%arg0: i32, %arg1: memref<4xi32, #tpu.memory_space<smem>>) -> (i32, i32) {
    %c0_i32 = arith.constant 0 : i32
    %c0_i32_0 = arith.constant 0 : i32
    %c0_i32_1 = arith.constant 0 : i32
    return %c0_i32, %c0_i32_0 : i32, i32
  }
}

</mosaic_0001>

<bundles_post_ra>
// kernel: tpu_custom_call.1
= control target key start
LH: loop header
LB: loop body
LE: loop exit
PB: predicated region body
PF: predicated region fallthrough
CT: control target
= control target key end

     0   :  { %s2435_s0 = inlined_call_operand.hbm [shape: s32[4], index: 0, kind: input, shape index: {}]   ;;  %s2436_s1 = inlined_call_operand.vmem [shape: s32[4,8,1], index: 1, kind: input, shape index: {}]   ;;  %s2437_s2 = inlined_call_operand.vmem [shape: s32[4,1,8], index: 2, kind: input, shape index: {}]   ;;  %s2438_s3 = inlined_call_operand.vmem [shape: f32[4,8,4], index: 3, kind: input, shape index: {}]   ;;  %s2439_s4 = inlined_call_operand.vmem [shape: f32[4,8,4], index: 4, kind: input, shape index: {}]   ;;  %s2440_s5 = inlined_call_operand.vmem [shape: f32[32,32], index: 5, kind: input, shape index: {}]   ;;  %s2441_s6 = inlined_call_operand.vmem [shape: f32[1,32], index: 6, kind: input, shape index: {}]   ;;  %s2442_s7 = inlined_call_operand.vmem [shape: f32[32,32], index: 7, kind: input, shape index: {}]   ;;  %s2443_s8 = inlined_call_operand.vmem [shape: f32[1,32], index: 8, kind: input, shape index: {}]   ;;  %s2444_s9 = inlined_call_operand.vmem [shape: f32[32,32], index: 9, kind: input, shape index: {}]   ;;  %s2445_s10 = inlined_call_operand.vmem [shape: f32[1,32], index: 10, kind: input, shape index: {}]   ;;  %s2446_s11 = inlined_call_operand.vmem [shape: f32[32,4], index: 11, kind: input, shape index: {}]   ;;  %s2447_s12 = inlined_call_operand.vmem [shape: f32[1,4], index: 12, kind: input, shape index: {}]   ;;  %s2448_s13 = inlined_call_operand.vmem [shape: f32[4,128], index: 13, kind: input, shape index: {}]   ;;  %s2449_s14 = inlined_call_operand.vmem [shape: f32[32,128], index: 14, kind: input, shape index: {}]   ;;  %s2450_s15 = inlined_call_operand.vmem [shape: f32[1,128], index: 15, kind: input, shape index: {}]   ;;  %s2451_s16 = inlined_call_operand.hbm [shape: f32[8,32], index: 16, kind: output, shape index: {0}]   ;;  %s2452_s17 = inlined_call_operand.hbm [shape: f32[8,32], index: 17, kind: output, shape index: {1}]   ;;  %s2453_s18 = inlined_call_operand.hbm [shape: f32[1,1], index: 18, kind: output, shape index: {2}]   ;;  %s2454_s19 = inlined_call_operand.hbm [shape: f32[1,1], index: 19, kind: output, shape index: {3}]  }
   0x1   :  { %2456 = sst [smem:[#allocation16_spill]] %s2435_s0  ;;  %s2063_s0 = smov [#allocation3]  }
   0x2   :  { %2457 = sst [smem:[#allocation17_spill]] %s2436_s1 }
   0x3   :  { %2458 = sst [smem:[#allocation18_spill]] %s2437_s2 }
   0x4   :  { %2459 = sst [smem:[#allocation19_spill]] %s2438_s3 }
   0x5   :  { %2460 = sst [smem:[#allocation20_spill]] %s2447_s12 }
   0x6   :  { %2461 = sst [smem:[#allocation21_spill]] %s2453_s18 }
   0x7   :  { %2462 = sst [smem:[#allocation22_spill]] %s2454_s19 }
   0x8   :  { %s2463_s12 = sld [smem:[#allocation16_spill]] }
   0xe   :  { %26 = dma.hbm_to_smem %s2463_s12, 16, %s2063_s0, [#allocation2] }
   0xf   :  { %2033 = dma.done.wait [#allocation2], 16 }
  0x10   :  { %2034 = vsyncadd [#allocation2], 4294967280 }
  0x11   :  { %28 = sfence }
  0x12   :  { %29 = vsyncpa [#allocation5], 0 }
  0x13   :  { %30 = vsyncpa [#allocation7], 0 }
  0x14   :  { %31 = vsyncpa [#allocation10], 0  ;;  %s2180_s21 = smov 0  }
  0x15 LB: > { %2464 = sst [smem:[#allocation15_spill]] %s2049_s21  ;;  %s2186_s1 = sadd.s32 4294967295, %s2049_s21   ;;  %s2049_s21 = sphi %s2180_s21, %s37_s21  }
  0x16   : > { %p1676_p0 = scmp.ge.s32.totalorder %s2049_s21, 1  ;;  %p532_p1 = scmp.lt.s32.totalorder %s2049_s21, 5 }
  0x18   : > { %p533_p2 = pnand %p1676_p0, %p532_p1 }
  0x19   : > { %p591_p3 = scmp.lt.s32.totalorder (!%p533_p2), %s2186_s1, 3  ;;  %s2466_s27 = sld [smem:[#allocation17_spill]] (!%p533_p2) }
  0x1a   : > { %536 = sbr.rel (%p533_p2) target bundleno = 1948 (0x79c), region = 80  ;;  %s2467_s30 = sld [smem:[#allocation19_spill]] (!%p533_p2) }
  0x1b   : > { %p1680_p4 = scmp.ne.s32.totalorder (!%p533_p2), %s2186_s1, 0 }
  0x1f   : > { %s2192_s12 = scalar_select %p591_p3, %s2186_s1, 3 }
  0x20   : > { %609 = sbr.rel (%p1680_p4) target bundleno = 40 (0x28), region = 84 }
  0x21   : > { %s2195_s22 = sshll.u32 %s2192_s12, 3 }
  0x22   : > { %s594_s28 = scalar_lea.vmem %s2466_s27, %s2195_s22  ;;  %s601_s20 = scalar_lea.vmem %s2467_s30, %s2195_s22 }
  0x25   : > { %vm610_vm0 = vcmask 261120   ;;  %vm613_vm1 = vcmask 0   ;;  %v2064_v0 = vmov 0.0  }
  0x26   : > { %611 = vst.msk [vmem:[#allocation4] sm:$0xff] %vm610_vm0, %v2064_v0  ;;  %612 = vst.msk [vmem:[#allocation6] sm:$0xff] %vm610_vm0, %v2064_v0 }
  0x27   : > { %614 = vst.msk [vmem:[#allocation8] sm:$0x1] %vm613_vm1, %v2064_v0  ;;  %615 = vst.msk [vmem:[#allocation9] sm:$0x1] %vm613_vm1, %v2064_v0 }
  0x28 PF: > { %v616_v1 = vld [vmem:[%s2440_s5] sm:$0xff]  ;;  %v617_v2 = vld [vmem:[%s2440_s5 + $0x8] sm:$0xff]  ;;  %v618_v3 = vld [vmem:[%s2440_s5 + $0x10] sm:$0xff]  ;;  %s2224_s26 = sld [smem:[#allocation3 + %s2186_s1]] }
  0x29   : > { %v619_v4 = vld [vmem:[%s2440_s5 + $0x18] sm:$0xff]  ;;  %v1682_v5 = vld [vmem:[%s2441_s6] ss:$0 sm:$0xff]  ;;  %v622_v7 = vld [vmem:[%s2442_s7 + $0x8] sm:$0xff] }
  0x2a   : > { %v621_v6 = vld [vmem:[%s2442_s7] sm:$0xff]  ;;  %v623_v8 = vld [vmem:[%s2442_s7 + $0x10] sm:$0xff]  ;;  %v624_v9 = vld [vmem:[%s2442_s7 + $0x18] sm:$0xff] }
  0x2b   : > { %v1685_v10 = vld [vmem:[%s2443_s8] ss:$0 sm:$0xff] }
  0x2d   : > { %v627_v11 = vld [vmem:[#allocation4] sm:$0xff]  }
  0x2e   : > { %p1681_p5 = scmp.le.s32.totalorder %s2224_s26, 0  ;;  %v2059_v12 = vmov %v627_v11  }
  0x2f   : > { %s2248_s0 = smov (!%p1681_p5), 0  }
  0x30   : > { %1615 = sbr.rel (%p1681_p5) target bundleno = 470 (0x1d6), region = 149 }
  0x35   : > { %v2051_v13 = vmov %v627_v11  }
  0x36 LB: >> { %v2065_v14 = vmov 0.0   ;;  %vm2066_vm2 = vmmov 0   ;;  %vm641_vm3 = vcmask 261120   ;;  %s631_s0 = sadd.s32 1, %s2057_s0   ;;  %s2057_s0 = sphi %s2248_s0, %s631_s0   ;;  %v2053_v13 = vphi %v2051_v13, %v2052_v13  }
  0x37   : >> { %1748 = vmatprep.subr.mxu0 %v2065_v14  ;;  %1756 = vmatprep.mubr.msk.f32.mxu0 %vm2066_vm2, %v2065_v14  ;;  %p630_p6 = scmp.ge.s32.totalorder %s631_s0, %s2224_s26 }
  0x38   : >> { %1749 = vmatpush3.msra.mxu0 %v619_v4  ;;  %1759 = vmatprep.subr.mxu1 %v2065_v14 }
  0x39   : >> { %1750 = vmatprep.subr.mxu0 %v2065_v14  ;;  %1760 = vmatpush3.msra.mxu1 %v624_v9 }
  0x3a   : >> { %1751 = vmatpush3.msra.mxu0 %v618_v3  ;;  %1761 = vmatprep.subr.mxu1 %v2065_v14 }
  0x3b   : >> { %1752 = vmatprep.subr.mxu0 %v2065_v14  ;;  %1762 = vmatpush3.msra.mxu1 %v623_v8 }
  0x3c   : >> { %1753 = vmatpush3.msra.mxu0 %v617_v2  ;;  %1763 = vmatprep.subr.mxu1 %v2065_v14 }
  0x3d   : >> { %1754 = vmatprep.subr.mxu0 %v2065_v14  ;;  %1764 = vmatpush3.msra.mxu1 %v622_v7 }
  0x3e   : >> { %1755 = vmatpush3.msra.mxu0 %v616_v1  ;;  %1765 = vmatprep.subr.mxu1 %v2065_v14 }
  0x3f   : >> { %1757 = vmatmul.mubr.msk.f32.vlgmr.msra.gmra.mxu0 %vm641_vm3, %v2053_v13  ;;  %1766 = vmatpush3.msra.mxu1 %v621_v6 }
  0x40   : >> { %1767 = vmatprep.mubr.msk.f32.mxu1 %vm2066_vm2, %v2065_v14 }
  0xff   : >> { %v711_v15 = vpop.f32.mrf.mxu0 }
 0x100   : >> { %v712_v16 = vadd.f32 %v1682_v5, %v711_v15 }
 0x101   : >> { %v1758_v17 = vpop.f32.mrf.mxu0 }
 0x102   : >> { %1902 = vtanh.f32 %v712_v16 }
 0x10f   : >> { %v1903_v18 = vpop.eup %1902 }
 0x110   : >> { %1768 = vmatmul.mubr.msk.f32.vlgmr.msra.gmra.mxu1 %vm641_vm3, %v1903_v18 }
 0x1d0   : >> { %v785_v19 = vpop.f32.mrf.mxu1 }
 0x1d1   : >> { %v789_v20 = vadd.f32 %v2053_v13, %v785_v19  ;;  %633 = sbr.rel (!%p630_p6) target bundleno = 54 (0x36), region = 155 }
 0x1d2   : >> { %v1769_v21 = vpop.f32.mrf.mxu1 }
 0x1d3   : >> { %v796_v22 = vadd.f32 %v1685_v10, %v789_v20  }
 0x1d5   : >> { %v2052_v13 = vmov %v796_v22   ;;  %v2060_v12 = vmov (%p630_p6), %v796_v22  }
 0x1d6 PF: > { %vm797_vm4 = vcmask 261120   ;;  %p1686_p7 = scmp.ge.s32.totalorder %s2186_s1, 3  ;;  %v2061_v12 = vphi %v2059_v12, %v2060_v12  }
 0x1d7   : > { %798 = vst.msk [vmem:[#allocation4] sm:$0xff] %vm797_vm4, %v2061_v12  ;;  %s2070_s25 = smov (!%p1686_p7), 32   ;;  %s2470_s29 = scalar_lea.vmem (!%p1686_p7), %s2439_s4, %s2195_s22 }
 0x1d8   : > { %802 = sbr.rel (%p1686_p7) target bundleno = 1887 (0x75f), region = 95  ;;  %s2471_s30 = sld [smem:[#allocation18_spill]] (!%p1686_p7) }
 0x1d9   : > { %s2072_s22 = smov (!%p1686_p7), 64   ;;  %s2473_s2 = sld [smem:[#allocation20_spill]] (!%p1686_p7) }
 0x1dd   : > { %v809_v23 = vld [vmem:[%s594_s28] sm:$0xff]  ;;  %v2067_v25 = vmov 0   ;;  %v2068_v26 = vmov 0.0   ;;  %v2269_v27 = vld [vmem:[#allocation6] sm:$0xff]  ;;  %vm2069_vm5 = vmmov 0   ;;  %v807_v28 = vlaneseq  ;;  %v973_v31 = vld [vmem:[%s2444_s9 + $0x18] sm:$0xff] }
 0x1de   : > { %v2266_v24 = vld [vmem:[#allocation4] sm:$0xff]  ;;  %1904 = vset.pattern.permute.xlu0 %v2067_v25  ;;  %1770 = vmatprep.subr.mxu0 %v2068_v26  ;;  %vm826_vm6 = vcmask 64512   ;;  %v972_v33 = vld [vmem:[%s2444_s9 + $0x10] sm:$0xff]  ;;  %v971_v34 = vld [vmem:[%s2444_s9 + $0x8] sm:$0xff]  ;;  %vm1250_vm8 = vcmask 1043456   ;;  %vm1143_vm9 = vcmask 31744   ;;  %s2472_s28 = scalar_lea.vmem %s2471_s30, %s2192_s12 }
 0x1df   : > { %811 = vperm.xlu0 %1904, %v809_v23   ;;  %1775 = vmatprep.subr.mxu1 %v2068_v26  ;;  %v808_v29 = vand.u32 127, %v807_v28  ;;  %v970_v35 = vld [vmem:[%s2444_s9] sm:$0xff]  ;;  %v1058_v36 = vld [vmem:[%s2446_s11 + $0x18] sm:$0xff]  ;;  %v1175_v40 = vld [vmem:[%s2449_s14 + $0x10] sm:$0xff]  ;;  %v817_v14 = vshrl.u32 %v807_v28, 7  ;;  %vm1156_vm11 = vcmask 0  }
 0x1e0   : > { %1771 = vmatpush3.msra.mxu0 %v2266_v24  ;;  %1772 = vmatprep.mubr.msk.f32.mxu0 %vm2069_vm5, %v2068_v26  ;;  %v1176_v37 = vld [vmem:[%s2449_s14 + $0x18] sm:$0xff]  ;;  %v1174_v43 = vld [vmem:[%s2449_s14 + $0x8] sm:$0xff]  ;;  %v1173_v44 = vld [vmem:[%s2449_s14] sm:$0xff] }
 0x1e1   : > { %1776 = vmatpush3.msra.mxu1 %v2269_v27  ;;  %1777 = vmatprep.mubr.msk.f32.mxu1 %vm2069_vm5, %v2068_v26  ;;  %v1057_v45 = vld [vmem:[%s2446_s11 + $0x10] sm:$0xff]  ;;  %v1056_v46 = vld [vmem:[%s2446_s11 + $0x8] sm:$0xff]  ;;  %v1055_v47 = vld [vmem:[%s2446_s11] sm:$0xff] }
 0x1e2   : > { %1780 = vmatprep.subr.mxu0 %v2068_v26  ;;  %1791 = vmatprep.subr.mxu1 %v2068_v26  ;;  %v1692_v48 = vld [vmem:[%s2445_s10] ss:$0 sm:$0xff] }
 0x1e3   : > { %v1172_v53 = vld [vmem:[%s2448_s13] sm:$0xf] }
 0x1e4   : > { %v805_v54 = vld [vmem:[%s601_s20] sm:$0xff]  ;;  %s2071_s20 = smov 96  }
 0x1e5   : > { %v1699_v60 = vld [vmem:[%s2450_s15] ss:$0 sm:$0xff] }
 0x1e6   : > { %v806_v12 = vld [vmem:[%s2470_s29] sm:$0xff] }
 0x1e7   : > { %v1159_v13 = vsel %vm1143_vm9, %v806_v12, 0.0  ;;  %v1688_v15 = vld [vmem:[%s2472_s28] ss:$0 sm:$0xff] }
 0x1e8   : > { %vm823_vm10 = vcmp.eq.s32.totalorder %v817_v14, %v1688_v15  ;;  %v1694_v21 = vld [vmem:[%s2473_s2] ss:$0 sm:$0xff] }
 0x1e9   : > { %v1689_v16 = vsel %vm823_vm10, 1.0, %v2068_v26 }
 0x1ea   : > { %v1360_v17 = vsel %vm826_vm6, %v1689_v16, 0.0 }
 0x25a   : > { %v812_v30 = vpop.permute.xlu0 %811 }
 0x25b   : > { %vm813_vm7 = vcmp.eq.s32.totalorder %v808_v29, %v812_v30 }
 0x25c   : > { %v1687_v32 = vsel %vm813_vm7, 1.0, %v2068_v26 }
 0x25d   : > { %1773 = vmatmul.mubr.msk.f32.vlgmr.msra.gmra.mxu0 %vm826_vm6, %v1687_v32  ;;  %1778 = vmatmul.mubr.msk.f32.vlgmr.msra.gmra.mxu1 %vm826_vm6, %v1687_v32 }
 0x25e   : > { %1781 = vmatpush3.msra.mxu0 %v973_v31  ;;  %1788 = vmatprep.mubr.msk.f32.mxu0 %vm2069_vm5, %v2068_v26 }
 0x25f   : > { %1782 = vmatprep.subr.mxu0 %v2068_v26  ;;  %1799 = vmatprep.mubr.msk.f32.mxu1 %vm2069_vm5, %v2068_v26 }
 0x260   : > { %1783 = vmatpush3.msra.mxu0 %v972_v33  ;;  %1792 = vmatpush3.msra.mxu1 %v1058_v36 }
 0x261   : > { %1784 = vmatprep.subr.mxu0 %v2068_v26  ;;  %1793 = vmatprep.subr.mxu1 %v2068_v26 }
 0x262   : > { %1785 = vmatpush3.msra.mxu0 %v971_v34  ;;  %1794 = vmatpush3.msra.mxu1 %v1057_v45 }
 0x263   : > { %1786 = vmatprep.subr.mxu0 %v2068_v26  ;;  %1795 = vmatprep.subr.mxu1 %v2068_v26 }
 0x264   : > { %1787 = vmatpush3.msra.mxu0 %v970_v35  ;;  %1796 = vmatpush3.msra.mxu1 %v1056_v46 }
 0x265   : > { %1802 = vmatprep.subr.mxu0 %v2068_v26  ;;  %1797 = vmatprep.subr.mxu1 %v2068_v26 }
 0x266   : > { %1798 = vmatpush3.msra.mxu1 %v1055_v47 }
 0x267   : > { %1813 = vmatprep.subr.mxu1 %v2068_v26 }
 0x31d   : > { %v896_v38 = vpop.f32.mrf.mxu0  ;;  %v966_v39 = vpop.f32.mrf.mxu1 }
 0x31e   : > { %1340 = vrot.lane.b32.xlu1 %v966_v39, %s2070_s25  ;;  %1789 = vmatmul.mubr.msk.f32.vlgmr.msra.gmra.mxu0 %vm797_vm4, %v896_v38 }
 0x31f   : > { %1803 = vmatpush3.msra.mxu0 %v1176_v37  ;;  %v1774_v41 = vpop.f32.mrf.mxu0  ;;  %v1779_v42 = vpop.f32.mrf.mxu1  ;;  %1810 = vmatprep.mubr.msk.f32.mxu0 %vm2069_vm5, %v2068_v26 }
 0x320   : > { %1804 = vmatprep.subr.mxu0 %v2068_v26 }
 0x321   : > { %1805 = vmatpush3.msra.mxu0 %v1175_v40 }
 0x322   : > { %1806 = vmatprep.subr.mxu0 %v2068_v26 }
 0x323   : > { %1807 = vmatpush3.msra.mxu0 %v1174_v43 }
 0x324   : > { %1808 = vmatprep.subr.mxu0 %v2068_v26 }
 0x325   : > { %1809 = vmatpush3.msra.mxu0 %v1173_v44 }
 0x326   : > { %1811 = vmatmul.mubr.msk.f32.vlgmr.msra.gmra.mxu0 %vm797_vm4, %v896_v38  ;;  %1823 = vmatprep.subr.mxu0 %v2068_v26 }
 0x327   : > { %1825 = vmatprep.mubr.msk.f32.mxu0 %vm2069_vm5, %v2068_v26 }
 0x390   : > { %v1341_v7 = vpop.permute.xlu1 %1340 }
 0x3de   : > { %v1050_v49 = vpop.f32.mrf.mxu0 }
 0x3df   : > { %v1051_v50 = vadd.f32 %v1692_v48, %v1050_v49 }
 0x3e0   : > { %v1790_v51 = vpop.f32.mrf.mxu0 }
 0x3e1   : > { %v1054_v52 = vmax.f32 %v1051_v50, 0.0  ;;  %v1139_v50 = vld [vmem:[#allocation8] sm:$0x1]  ;;  %v1158_v51 = vld [vmem:[#allocation9] sm:$0x1] }
 0x3e3   : > { %1800 = vmatmul.mubr.msk.f32.vlgmr.msra.gmra.mxu1 %vm797_vm4, %v1054_v52 }
 0x3e4   : > { %1814 = vmatpush3.msk.msra.mxu1 %vm1250_vm8, %v1172_v53  ;;  %1815 = vmatprep.mubr.msk.f32.mxu1 %vm2069_vm5, %v2068_v26 }
 0x3e5   : > { %1818 = vmatprep.subr.mxu1 %v2068_v26 }
 0x3e6   : > { %v1243_v55 = vpop.f32.mrf.mxu0 }
 0x3e7   : > { %1816 = vmatmul.mubr.msk.f32.vlgmr.msra.gmra.mxu1 %vm1143_vm9, %v805_v54 }
 0x3e8   : > { %v1812_v56 = vpop.f32.mrf.mxu0  ;;  %1820 = vmatprep.mubr.msk.f32.mxu1 %vm2069_vm5, %v2068_v26 }
 0x4a3   : > { %v1135_v57 = vpop.f32.mrf.mxu1 }
 0x4a4   : > { %v1136_v22 = vadd.f32 %v1694_v21, %v1135_v57 }
 0x4a5   : > { %v1801_v58 = vpop.f32.mrf.mxu1 }
 0x4a6   : > { %v1140_v23 = vsub.f32 %v805_v54, %v1136_v22 }
 0x4a7   : > { %v1320_v59 = vpop.f32.mrf.mxu1 }
 0x4a8   : > { %v1321_v61 = vadd.f32 %v1320_v59, %v1243_v55  ;;  %v1141_v25 = vand.u32 2147483647, %v1140_v23 }
 0x4a9   : > { %v1817_v62 = vpop.f32.mrf.mxu1 }
 0x4aa   : > { %v1331_v63 = vadd.f32 %v1699_v60, %v1321_v61  ;;  %v1142_v28 = vmul.f32 %v1141_v25, %v806_v12 }
 0x4ac   : > { %1905 = vtanh.f32 %v1331_v63  ;;  %v1700_v1 = vmul.f32 -1.442695, %v1331_v63  ;;  %v1144_v26 = vsel %vm1143_vm9, %v1142_v28, 0.0 }
 0x4ae   : > { %1907 = vpow2.f32 %v1700_v1 }
 0x4b9   : > { %v1906_v0 = vpop.eup %1905 }
 0x4ba   : > { %1345 = vrot.lane.b32.xlu0 %v1906_v0, %s2070_s25 }
 0x4bb   : > { %v1908_v2 = vpop.eup %1907 }
 0x4bc   : > { %v1335_v3 = vadd.f32 1.0, %v1908_v2 }
 0x4be   : > { %1909 = vrcp.f32 %v1335_v3 }
 0x4cb   : > { %v1910_v4 = vpop.eup %1909 }
 0x4cc   : > { %v1343_v8 = vmul.f32 %v1910_v4, %v1341_v7 }
 0x52c   : > { %v1346_v5 = vpop.permute.xlu0 %1345 }
 0x52d   : > { %v1348_v6 = vmul.f32 %v1910_v4, %v1346_v5 }
 0x52f   : > { %1350 = vrot.lane.b32.xlu1 %v1348_v6, %s2070_s25 }
 0x5a1   : > { %v1351_v9 = vpop.permute.xlu1 %1350 }
 0x5a2   : > { %v1353_v10 = vadd.f32 %v1351_v9, %v1343_v8 }
 0x5a4   : > { %1911 = vtanh.f32 %v1353_v10 }
 0x5b1   : > { %v1912_v11 = vpop.eup %1911 }
 0x5b2   : > { %1356 = vrot.lane.b32.xlu0 %v1912_v11, %s2070_s25 }
 0x5b6   : > { %1446 = vrot.lane.b32.xlu0 %v1353_v10, %s2071_s20 }
 0x5d5   : > { %1160 = vadd.xlane.f32.xlu0 %v1159_v13 }
 0x5d9   : > { %1361 = vadd.xlane.f32.xlu0 %v1360_v17 }
 0x624   : > { %v1357_v18 = vpop.permute.xlu0 %1356 }
 0x625   : > { %v1359_v19 = vmul.f32 %v1910_v4, %v1357_v18 }
 0x627   : > { %1366 = vrot.lane.b32.xlu1 %v1359_v19, %s2072_s22 }
 0x628   : > { %v1447_v20 = vpop.permute.xlu0 %1446 }
 0x629   : > { %1824 = vmatpush3.msra.mxu0 %v1447_v20 }
 0x62a   : > { %1826 = vmatmul.mubr.msk.f32.vlgmr.msra.gmra.mxu0 %vm826_vm6, %v1689_v16 }
 0x64b   : > { %1145 = vadd.xlane.f32.xlu1 %v1144_v26 }
 0x65e   : > { %v1161_v30 = vpop.xlane.xlu0 %1160 }
 0x65f   : > { %v1162_v31 = vrot.slane %v1161_v30, 4 }
 0x661   : > { %v1163_v32 = vadd.f32 %v1162_v31, %v1161_v30 }
 0x662   : > { %v1362_v44 = vpop.xlane.xlu0 %1361 }
 0x663   : > { %v1164_v33 = vrot.slane %v1163_v32, 2  ;;  %v1363_v45 = vsub.f32 1.0, %v1362_v44 }
 0x665   : > { %v1165_v36 = vadd.f32 %v1164_v33, %v1163_v32  ;;  %v1444_v46 = vmul.f32 %v1363_v45, %v2269_v27  ;;  %v1364_v56 = vmul.f32 %v1363_v45, %v2266_v24 }
 0x667   : > { %v1166_v39 = vrot.slane %v1165_v36, 1 }
 0x669   : > { %v1167_v42 = vadd.f32 %v1166_v39, %v1165_v36 }
 0x699   : > { %v1367_v29 = vpop.permute.xlu1 %1366 }
 0x69a   : > { %1819 = vmatpush3.msra.mxu1 %v1367_v29 }
 0x69b   : > { %1821 = vmatmul.mubr.msk.f32.vlgmr.msra.gmra.mxu1 %vm826_vm6, %v1689_v16 }
 0x6d4   : > { %v1146_v34 = vpop.xlane.xlu1 %1145 }
 0x6d5   : > { %v1147_v35 = vrot.slane %v1146_v34, 4 }
 0x6d7   : > { %v1148_v37 = vadd.f32 %v1147_v35, %v1146_v34 }
 0x6d9   : > { %v1149_v38 = vrot.slane %v1148_v37, 2 }
 0x6db   : > { %v1150_v40 = vadd.f32 %v1149_v38, %v1148_v37 }
 0x6dd   : > { %v1151_v41 = vrot.slane %v1150_v40, 1 }
 0x6df   : > { %v1152_v43 = vadd.f32 %v1151_v41, %v1150_v40 }
 0x6e1   : > { %1828 = vpush %v1152_v43 }
 0x6e2   : > { %1830 = vpush %v1167_v42 }
 0x6ea   : > { %v1515_v47 = vpop.f32.mrf.mxu0 }
 0x6eb   : > { %v1519_v48 = vadd.f32 %v1515_v47, %v1444_v46 }
 0x6ec   : > { %v1827_v49 = vpop.f32.mrf.mxu0 }
 0x6ed   : > { %1520 = vst.msk [vmem:[#allocation6] sm:$0xff] %vm797_vm4, %v1519_v48 }
 0x712   : > { %s1829_s12 = spop %1828 }
 0x713   : > { %v1154_v52 = vstv %s1829_s12  ;;  %s1831_s23 = spop %1830 }
 0x714   : > { %v1155_v53 = vadd.f32 %v1154_v52, %v1139_v50  ;;  %v1169_v54 = vstv %s1831_s23 }
 0x715   : > { %v1170_v55 = vadd.f32 %v1169_v54, %v1158_v51 }
 0x716   : > { %1157 = vst.msk [vmem:[#allocation8] sm:$0x1] %vm1156_vm11, %v1155_v53 }
 0x717   : > { %1171 = vst.msk [vmem:[#allocation9] sm:$0x1] %vm1156_vm11, %v1170_v55 }
 0x75b   : > { %v1438_v57 = vpop.f32.mrf.mxu1 }
 0x75c   : > { %v1442_v27 = vadd.f32 %v1438_v57, %v1364_v56 }
 0x75d   : > { %v1822_v58 = vpop.f32.mrf.mxu1 }
 0x75e   : > { %1443 = vst.msk [vmem:[#allocation4] sm:$0xff] %vm797_vm4, %v1442_v27 }
 0x75f PF: > { %p1848_p8 = scmp.eq.s32.totalorder %s2186_s1, 3  ;;  %s2073_s24 = smov [#allocation6]  }
 0x760   : > { %s1539_s3 = sshll.u32 %s2073_s24, 4  ;;  %s1540_s3 = int_to_ptr.vmem [resolvable:$true] %s1539_s3 }
 0x761   : > { %s1921_s19 = scalar_lea.vmem %s1540_s3, 128  ;;  %p1928_p12 = scmp.lt.s32.totalorder %s1540_s3, %s1540_s3 }
 0x762   : > { %p1922_p9 = scmp.ne.s32.totalorder %s1540_s3, %s1921_s19  ;;  %p1929_p13 = scmp.lt.s32.totalorder %s1921_s19, %s1921_s19 }
 0x764   : > { %p1923_p10 = pnand %p1922_p9, %p1848_p8  ;;  %p1930_p0 = por %p1929_p13, %p1928_p12 }
 0x766   : > { %p1924_p11 = pneg %p1923_p10 }
 0x768   : > { %p1931_p1 = pnand %p1930_p0, %p1924_p11 }
 0x76a   : > { %1934 = shalt.err (!%p1931_p1)
}
 0x76b   : > { %1835 = dma.vmem_to_hbm [thread:$0]  (%p1848_p8), %s1540_s3, 128, %s2452_s17, [#allocation7]  }
 0x76c   : > { %s2074_s27 = smov [#allocation4]   ;;  %s2075_s0 = smov [#allocation8]  }
 0x76d   : > { %s1528_s29 = sshll.u32 %s2074_s27, 4  ;;  %s1550_s18 = sshll.u32 %s2075_s0, 4  ;;  %s1529_s29 = int_to_ptr.vmem [resolvable:$true] %s1528_s29  ;;  %s1551_s18 = int_to_ptr.vmem [resolvable:$true] %s1550_s18 }
 0x76e   : > { %s1945_s30 = scalar_lea.vmem %s1529_s29, 128  ;;  %p1952_p5 = scmp.lt.s32.totalorder %s1529_s29, %s1529_s29 }
 0x76f   : > { %p1946_p2 = scmp.ne.s32.totalorder %s1529_s29, %s1945_s30  ;;  %p1953_p6 = scmp.lt.s32.totalorder %s1945_s30, %s1945_s30 }
 0x771   : > { %p1947_p3 = pnand %p1946_p2, %p1848_p8  ;;  %p1954_p7 = por %p1953_p6, %p1952_p5 }
 0x773   : > { %p1948_p4 = pneg %p1947_p3 }
 0x775   : > { %p1955_p9 = pnand %p1954_p7, %p1948_p4 }
 0x777   : > { %1958 = shalt.err (!%p1955_p9)
}
 0x778   : > { %1833 = dma.vmem_to_hbm [thread:$0]  (%p1848_p8), %s1529_s29, 128, %s2451_s16, [#allocation5]  }
 0x779   : > { %s1969_s25 = scalar_lea.vmem %s1551_s18, 16  ;;  %s1975_s26 = scalar_lea.vmem %s1551_s18, 32 }
 0x77a   : > { %p1970_p10 = scmp.ne.s32.totalorder %s1551_s18, %s1969_s25  ;;  %p1976_p13 = scmp.lt.s32.totalorder %s1551_s18, %s1551_s18 }
 0x77b   : > { %p1977_p0 = scmp.lt.s32.totalorder %s1975_s26, %s1969_s25 }
 0x77c   : > { %p1971_p11 = pnand %p1970_p10, %p1848_p8 }
 0x77d   : > { %p1978_p1 = por %p1977_p0, %p1976_p13 }
 0x77e   : > { %p1972_p12 = pneg %p1971_p11 }
 0x780   : > { %p1979_p2 = pnand %p1978_p1, %p1972_p12 }
 0x782   : > { %1982 = shalt.err (!%p1979_p2)
}
 0x783   : > { %s2474_s23 = sld [smem:[#allocation21_spill]]  ;;  %s2076_s24 = smov [#allocation9]  }
 0x784   : > { %s1561_s3 = sshll.u32 %s2076_s24, 4  ;;  %s1562_s3 = int_to_ptr.vmem [resolvable:$true] %s1561_s3 }
 0x785   : > { %s1993_s19 = scalar_lea.vmem %s1562_s3, 16  ;;  %s1999_s20 = scalar_lea.vmem %s1562_s3, 32 }
 0x786   : > { %p1994_p3 = scmp.ne.s32.totalorder %s1562_s3, %s1993_s19  ;;  %p2000_p6 = scmp.lt.s32.totalorder %s1562_s3, %s1562_s3 }
 0x787   : > { %p2001_p7 = scmp.lt.s32.totalorder %s1999_s20, %s1993_s19 }
 0x788   : > { %p1995_p4 = pnand %p1994_p3, %p1848_p8 }
 0x789   : > { %1837 = dma.vmem_to_hbm [thread:$0]  (%p1848_p8), %s1551_s18, 16, %s2474_s23, [#allocation7]  }
 0x78a   : > { %p1996_p5 = pneg %p1995_p4  ;;  %p2002_p9 = por %p2001_p7, %p2000_p6 }
 0x78c   : > { %p2003_p10 = pnand %p2002_p9, %p1996_p5 }
 0x78e   : > { %2006 = shalt.err (!%p2003_p10)
}
 0x78f   : > { %s2475_s29 = sld [smem:[#allocation22_spill]] }
 0x795   : > { %1839 = dma.vmem_to_hbm [thread:$0]  (%p1848_p8), %s1562_s3, 16, %s2475_s29, [#allocation10]  }
 0x796   : > { %2036 = dma.done.wait (%p1848_p8), [#allocation5], 128  }
 0x797   : > { %2038 = vsyncadd (%p1848_p8), [#allocation5], 4294967168 }
 0x798   : > { %2040 = dma.done.wait (%p1848_p8), [#allocation7], 144  }
 0x799   : > { %2042 = vsyncadd (%p1848_p8), [#allocation7], 4294967152 }
 0x79a   : > { %2044 = dma.done.wait (%p1848_p8), [#allocation10], 16  }
 0x79b   : > { %2046 = vsyncadd (%p1848_p8), [#allocation10], 4294967280 }
 0x79c PF: > { %s2476_s0 = sld [smem:[#allocation15_spill]] }
 0x7a2   : > { %s37_s21 = sadd.s32 1, %s2476_s0  }
 0x7a3   : > { %p34_p11 = scmp.ge.s32.totalorder %s37_s21, 6  }
 0x7a5   :  { %36 = sbr.rel (!%p34_p11) target bundleno = 21 (0x15), region = 166 }
 0x7aa   :  { %1586 = vsyncpa [#allocation5], 1 }
 0x7ab   :  { %1588 = vsyncpa [#allocation5 + $0x1], 1 }
 0x7ac   :  { %1589 = vsyncpa [#allocation7], 1 }
 0x7ad   :  { %1590 = vsyncpa [#allocation10], 1 }

</bundles_post_ra>
